<compile_context>
chip_gen: v6e
topology: v6e:2x2x1
jax: 0.10.0
libtpu: 0.0.40
codegen_flags: <defaults>
</compile_context>

<pallas_src>
import functools

import jax
import jax.numpy as jnp
from jax.experimental import pallas as pl
from jax.experimental.pallas import tpu as pltpu


def _round_up(x, m):
    return ((x + m - 1) // m) * m


def _tpu_vmem_capacity_bytes():
    """Physical VMEM per core (generation-aware), with a conservative fallback."""
    try:
        info = pltpu.get_tpu_info()
        cap = int(getattr(info, "vmem_capacity_bytes", 0) or 0)
        if cap > 0:
            return cap
    except Exception:
        pass
    return 64 << 20  # v7x per-TensorCore VMEM (smallest current generation)


def _vmem_limit(need_bytes, vmem_cap):
    # At least the 32 MiB default; stay under ~80% of physical VMEM.
    clamp = max(32 << 20, min(int(vmem_cap * 0.8), vmem_cap - (8 << 20)))
    return int(min(max(need_bytes, 32 << 20), clamp))


# ---------------------------------------------------------------------------
# Fused single-pass kernel: pool -> FC -> ReLU -> FC -> sigmoid -> scale.
# ---------------------------------------------------------------------------
def _ca_fused_kernel(x_ref, w1t_ref, b1_ref, w2t_ref, b2_ref, o_ref, *, inv_hw):
    x = x_ref[...]                                        # (bt, C, HW)
    # Global average pool: f32 accumulation only, no full-block f32 copy kept
    # live through the final multiply.
    pooled = jnp.sum(x, axis=-1, dtype=jnp.float32) * inv_hw      # (bt, C)
    # 1x1 conv #1 == dense + ReLU (weights are VMEM-resident, f32).
    z = jnp.dot(pooled, w1t_ref[...], preferred_element_type=jnp.float32)
    z = jnp.maximum(z + b1_ref[...], 0.0)                 # (bt, C_red_pad)
    # 1x1 conv #2 == dense + sigmoid.
    s = jnp.dot(z, w2t_ref[...], preferred_element_type=jnp.float32)
    s = jax.nn.sigmoid(s + b2_ref[...])                   # (bt, C)
    # Scale in the input dtype (ragged last batch block: garbage rows are
    # simply dropped by the boundary store).
    o_ref[...] = x * s.astype(x.dtype)[:, :, None]


# ---------------------------------------------------------------------------
# Two-pass fallback, pass 1: streaming pool over HW tiles + gate MLP.
# The h (reduction) axis is last in the grid and "arbitrary": the accumulator
# scratch is re-zeroed at h == 0 and consumed at h == n_hw - 1 for each b.
# ---------------------------------------------------------------------------
def _ca_pool_gate_kernel(x_ref, w1t_ref, b1_ref, w2t_ref, b2_ref,
                         gate_ref, sum_sc, *, inv_hw, hw, hw_tile, ragged):
    h = pl.program_id(1)

    @pl.when(h == 0)
    def _():
        sum_sc[...] = jnp.zeros_like(sum_sc)

    x = x_ref[...]                                        # (1, C, hw_tile)
    if ragged:
        # Last HW tile extends past HW: mask the out-of-bounds lanes so the
        # pool sum is exact (boundary input values are unspecified).
        lane = jax.lax.broadcasted_iota(jnp.int32, x.shape, 2)
        x = jnp.where(lane + h * hw_tile < hw, x, jnp.zeros_like(x))
    sum_sc[...] += jnp.sum(x, axis=-1, dtype=jnp.float32)  # (1, C)

    @pl.when(h == pl.num_programs(1) - 1)
    def _():
        pooled = sum_sc[...] * inv_hw                     # (1, C)
        z = jnp.dot(pooled, w1t_ref[...], preferred_element_type=jnp.float32)
        z = jnp.maximum(z + b1_ref[...], 0.0)
        s = jnp.dot(z, w2t_ref[...], preferred_element_type=jnp.float32)
        s = jax.nn.sigmoid(s + b2_ref[...])               # (1, C)
        gate_ref[...] = s[:, :, None]                     # (1, C, 1)


# ---------------------------------------------------------------------------
# Two-pass fallback, pass 2: lane-dense tiled broadcast multiply (native dtype).
# ---------------------------------------------------------------------------
def _ca_scale_kernel(x_ref, gate_ref, o_ref):
    o_ref[...] = x_ref[...] * gate_ref[...].astype(x_ref.dtype)


def ca_layer(x_nchw, w1, b1, w2, b2, *,
             per_block_budget_bytes=None,
             force_two_pass=False):
    """x_nchw: (N, C, H, W). w1: (C_red, C), b1: (C_red,), w2: (C, C_red), b2: (C,)."""
    N, C, H, W = x_nchw.shape
    C_red = w1.shape[0]
    HW = H * W
    itemsize = jnp.dtype(x_nchw.dtype).itemsize

    vmem_cap = _tpu_vmem_capacity_bytes()
    if per_block_budget_bytes is None:
        # ~1/10 of physical VMEM: ~6 MiB on v7x (64 MiB), ~12 MiB on v5e/v6e (128 MiB).
        per_block_budget_bytes = max(4 << 20, vmem_cap // 10)

    # Pad the bottleneck width to a sublane-friendly size (zero padding is
    # mathematically inert: relu(0 + 0) = 0 and the padded rows of w2t are 0).
    c_red_pad = _round_up(max(C_red, 8), 8)
    w1t = jnp.zeros((C, c_red_pad), jnp.float32).at[:, :C_red].set(
        jnp.transpose(w1).astype(jnp.float32))
    b1r = jnp.zeros((1, c_red_pad), jnp.float32).at[:, :C_red].set(
        b1.astype(jnp.float32)[None, :])
    w2t = jnp.zeros((c_red_pad, C), jnp.float32).at[:C_red, :].set(
        jnp.transpose(w2).astype(jnp.float32))
    b2r = b2.astype(jnp.float32).reshape(1, C)
    weight_bytes = 4 * (2 * C * c_red_pad + c_red_pad + C)

    x = x_nchw.reshape(N, C, HW)          # free: merges contiguous trailing dims
    slab_bytes = C * HW * itemsize        # one batch element
    gate_flops = 4 * N * C * c_red_pad
    inv_hw = 1.0 / HW

    if not force_two_pass and slab_bytes <= per_block_budget_bytes:
        # ------------------ fused single-pass path ------------------
        b_tile = max(1, min(N, per_block_budget_bytes // slab_bytes))
        # Target >= 4 grid steps (>= 2 per TensorCore after megacore sharding
        # on v7x) so DMA and compute overlap, but keep blocks >= ~1 MiB so the
        # ~0.35 us per-step overhead stays amortized.
        target_steps = 4
        min_tile = max(1, pl.cdiv(1 << 20, slab_bytes))
        b_tile = min(b_tile, max(N // target_steps, min_tile))
        b_tile = max(1, min(b_tile, N))
        n_steps = pl.cdiv(N, b_tile)      # ragged last block handled by Pallas

        block_bytes = b_tile * slab_bytes
        vmem_limit = _vmem_limit(4 * block_bytes + b_tile * C * HW * 4
                                 + weight_bytes + (8 << 20), vmem_cap)

        out = pl.pallas_call(
            functools.partial(_ca_fused_kernel, inv_hw=inv_hw),
            out_shape=jax.ShapeDtypeStruct((N, C, HW), x.dtype),
            grid_spec=pltpu.PrefetchScalarGridSpec(
                num_scalar_prefetch=0,
                grid=(n_steps,),
                in_specs=[
                    pl.BlockSpec((b_tile, C, HW), lambda b: (b, 0, 0)),
                    pl.BlockSpec((C, c_red_pad), lambda b: (0, 0)),
                    pl.BlockSpec((1, c_red_pad), lambda b: (0, 0)),
                    pl.BlockSpec((c_red_pad, C), lambda b: (0, 0)),
                    pl.BlockSpec((1, C), lambda b: (0, 0)),
                ],
                out_specs=pl.BlockSpec((b_tile, C, HW), lambda b: (b, 0, 0)),
            ),
            compiler_params=pltpu.CompilerParams(
                dimension_semantics=("parallel",),
                vmem_limit_bytes=vmem_limit),
            cost_estimate=pl.CostEstimate(
                flops=int(2 * N * C * HW + gate_flops),
                transcendentals=int(N * C),
                bytes_accessed=int(2 * N * C * HW * itemsize + weight_bytes)),
        )(x, w1t, b1r, w2t, b2r)
        return out.reshape(N, C, H, W)

    # ------------------ two-pass path (large feature maps) ------------------
    # Lane-dense HW tile (multiple of 128) sized against the block budget and
    # balanced so the ragged remainder is < 128 lanes (no host-side padding).
    hw_tile_max = max(128, (per_block_budget_bytes // (C * itemsize)) // 128 * 128)
    n_tiles = pl.cdiv(HW, hw_tile_max)
    if n_tiles <= 1:
        hw_tile = HW                      # single full-extent block (always legal)
    else:
        hw_tile = _round_up(pl.cdiv(HW, n_tiles), 128)
    n_hw = pl.cdiv(HW, hw_tile)
    ragged_hw = (HW % hw_tile) != 0       # last tile is masked in the pool kernel

    block_bytes = C * hw_tile * itemsize
    vmem_limit = _vmem_limit(5 * block_bytes + weight_bytes + (8 << 20), vmem_cap)

    # Pass 1: streaming global-average pool (f32 accumulation) + tiny gate MLP,
    # computed on the last HW tile of each batch element.
    gates = pl.pallas_call(
        functools.partial(_ca_pool_gate_kernel, inv_hw=inv_hw,
                          hw=HW, hw_tile=hw_tile, ragged=ragged_hw),
        out_shape=jax.ShapeDtypeStruct((N, C, 1), jnp.float32),
        grid_spec=pltpu.PrefetchScalarGridSpec(
            num_scalar_prefetch=0,
            grid=(N, n_hw),
            in_specs=[
                pl.BlockSpec((1, C, hw_tile), lambda b, h: (b, 0, h)),
                pl.BlockSpec((C, c_red_pad), lambda b, h: (0, 0)),
                pl.BlockSpec((1, c_red_pad), lambda b, h: (0, 0)),
                pl.BlockSpec((c_red_pad, C), lambda b, h: (0, 0)),
                pl.BlockSpec((1, C), lambda b, h: (0, 0)),
            ],
            out_specs=pl.BlockSpec((1, C, 1), lambda b, h: (b, 0, 0)),
            scratch_shapes=[pltpu.VMEM((1, C), jnp.float32)],
        ),
        compiler_params=pltpu.CompilerParams(
            dimension_semantics=("parallel", "arbitrary"),
            vmem_limit_bytes=vmem_limit),
        cost_estimate=pl.CostEstimate(
            flops=int(N * C * HW + gate_flops),
            transcendentals=int(N * C),
            bytes_accessed=int(N * C * HW * itemsize + weight_bytes + N * C * 4)),
    )(x, w1t, b1r, w2t, b2r)

    # Pass 2: lane-dense tiled broadcast multiply (both axes parallel).
    out = pl.pallas_call(
        _ca_scale_kernel,
        out_shape=jax.ShapeDtypeStruct((N, C, HW), x.dtype),
        grid_spec=pltpu.PrefetchScalarGridSpec(
            num_scalar_prefetch=0,
            grid=(N, n_hw),
            in_specs=[
                pl.BlockSpec((1, C, hw_tile), lambda b, h: (b, 0, h)),
                pl.BlockSpec((1, C, 1), lambda b, h: (b, 0, 0)),
            ],
            out_specs=pl.BlockSpec((1, C, hw_tile), lambda b, h: (b, 0, h)),
        ),
        compiler_params=pltpu.CompilerParams(
            dimension_semantics=("parallel", "parallel"),
            vmem_limit_bytes=vmem_limit),
        cost_estimate=pl.CostEstimate(
            flops=int(N * C * HW),
            transcendentals=0,
            bytes_accessed=int(2 * N * C * HW * itemsize + N * C * 4)),
    )(x, gates)
    return out.reshape(N, C, H, W)


def _reference(x, w1, b1, w2, b2):
    # Pure-JAX reference of the PyTorch forward.
    pooled = jnp.mean(x, axis=(2, 3))                              # (N, C)
    z = jnp.maximum(pooled @ w1.T + b1, 0.0)                       # (N, C_red)
    s = jax.nn.sigmoid(z @ w2.T + b2)                              # (N, C)
    return x * s[:, :, None, None]


if __name__ == "__main__":
    key = jax.random.PRNGKey(0)
    C = 64
    reduction = 16
    C_red = C // reduction

    k_x, k_x2, k_x3, k_w1, k_b1, k_w2, k_b2 = jax.random.split(key, 7)
    # Deterministic synthetic parameters (shapes match nn.Conv2d(C, C//r, 1) etc.)
    w1 = jax.random.normal(k_w1, (C_red, C), dtype=jnp.float32) * 0.1
    b1 = jax.random.normal(k_b1, (C_red,), dtype=jnp.float32) * 0.1
    w2 = jax.random.normal(k_w2, (C, C_red), dtype=jnp.float32) * 0.1
    b2 = jax.random.normal(k_b2, (C,), dtype=jnp.float32) * 0.1

    # 1) Fused single-pass path.
    x = jax.random.normal(k_x, (2, C, 16, 16), dtype=jnp.float32)
    out = ca_layer(x, w1, b1, w2, b2)
    jax.block_until_ready(out)
    assert out.shape == x.shape
    assert jnp.allclose(out, _reference(x, w1, b1, w2, b2),
                        atol=1e-5, rtol=1e-5), "fused path mismatch"

    # 2) Fused path with a ragged batch block (N=3, b_tile=2 -> partial last
    #    block, handled in-kernel; no host-side pad/slice).
    x3 = jax.random.normal(k_x3, (3, C, 16, 16), dtype=jnp.float32)
    slab = C * 16 * 16 * 4
    out3 = ca_layer(x3, w1, b1, w2, b2, per_block_budget_bytes=2 * slab)
    jax.block_until_ready(out3)
    assert jnp.allclose(out3, _reference(x3, w1, b1, w2, b2),
                        atol=1e-5, rtol=1e-5), "ragged-batch fused path mismatch"

    # 3) Two-pass (large feature map) path, forced with a tiny block budget and
    #    a non-multiple-of-128 HW (18*14 = 252) so HW tiling, the streaming
    #    pool accumulator and the ragged-tile lane masking are all exercised.
    x2 = jax.random.normal(k_x2, (2, C, 18, 14), dtype=jnp.float32)
    out2 = ca_layer(x2, w1, b1, w2, b2,
                    per_block_budget_bytes=32 * 1024, force_two_pass=True)
    jax.block_until_ready(out2)
    assert out2.shape == x2.shape
    assert jnp.allclose(out2, _reference(x2, w1, b1, w2, b2),
                        atol=1e-5, rtol=1e-5), "two-pass path mismatch"

    print("KERNEL_OK")
</pallas_src>

<mosaic_0001>
module attributes {stable_mosaic.version = 11 : i64} {
  func.func @_ca_fused_kernel(%arg0: i32, %arg1: memref<2x64x256xf32, #tpu.memory_space<vmem>>, %arg2: memref<64x8xf32, #tpu.memory_space<vmem>>, %arg3: memref<1x8xf32, #tpu.memory_space<vmem>>, %arg4: memref<8x64xf32, #tpu.memory_space<vmem>>, %arg5: memref<1x64xf32, #tpu.memory_space<vmem>>, %arg6: memref<2x64x256xf32, #tpu.memory_space<vmem>>) attributes {dimension_semantics = [#tpu.dimension_semantics<parallel>], iteration_bounds = array<i64: 1>, scalar_prefetch = 0 : i64, scratch_operands = 0 : i64, tpu.core_type = #tpu.core_type<tc>, window_params = [{transform_indices = @transform_0, window_bounds = array<i64: 2, 64, 256>}, {pipeline_mode = #tpu.pipeline_mode<synchronous>, transform_indices = @transform_1, window_bounds = array<i64: 64, 8>}, {pipeline_mode = #tpu.pipeline_mode<synchronous>, transform_indices = @transform_2, window_bounds = array<i64: 1, 8>}, {pipeline_mode = #tpu.pipeline_mode<synchronous>, transform_indices = @transform_3, window_bounds = array<i64: 8, 64>}, {pipeline_mode = #tpu.pipeline_mode<synchronous>, transform_indices = @transform_4, window_bounds = array<i64: 1, 64>}, {transform_indices = @transform_5, window_bounds = array<i64: 2, 64, 256>}]} {
    %c0 = arith.constant 0 : index
    %c0_0 = arith.constant 0 : index
    %c0_1 = arith.constant 0 : index
    %0 = vector.load %arg1[%c0, %c0_0, %c0_1] : memref<2x64x256xf32, #tpu.memory_space<vmem>>, vector<2x64x256xf32>
    %cst = arith.constant dense<0.000000e+00> : vector<2x64xf32>
    %1 = vector.multi_reduction <add>, %0, %cst [2] : vector<2x64x256xf32> to vector<2x64xf32>
    %cst_2 = arith.constant 3.906250e-03 : f32
    %2 = vector.broadcast %cst_2 : f32 to vector<2x64xf32>
    %3 = arith.mulf %1, %2 : vector<2x64xf32>
    %c0_3 = arith.constant 0 : index
    %c0_4 = arith.constant 0 : index
    %4 = vector.load %arg2[%c0_3, %c0_4] : memref<64x8xf32, #tpu.memory_space<vmem>>, vector<64x8xf32>
    %cst_5 = arith.constant dense<0.000000e+00> : vector<2x8xf32>
    %5 = tpu.matmul %3, %4, %cst_5 {dimension_numbers = #tpu.dot_dimension_numbers<[1], [0], [0], [1], [0, 0, 1, 1], [], []>} : vector<2x64xf32>, vector<64x8xf32>, vector<2x8xf32> -> vector<2x8xf32>
    %c0_6 = arith.constant 0 : index
    %c0_7 = arith.constant 0 : index
    %6 = vector.load %arg3[%c0_6, %c0_7] : memref<1x8xf32, #tpu.memory_space<vmem>>, vector<1x8xf32>
    %7 = vector.broadcast %6 : vector<1x8xf32> to vector<2x8xf32>
    %8 = arith.addf %5, %7 : vector<2x8xf32>
    %cst_8 = arith.constant 0.000000e+00 : f32
    %9 = vector.broadcast %cst_8 : f32 to vector<2x8xf32>
    %10 = arith.maximumf %8, %9 : vector<2x8xf32>
    %c0_9 = arith.constant 0 : index
    %c0_10 = arith.constant 0 : index
    %11 = vector.load %arg4[%c0_9, %c0_10] : memref<8x64xf32, #tpu.memory_space<vmem>>, vector<8x64xf32>
    %cst_11 = arith.constant dense<0.000000e+00> : vector<2x64xf32>
    %12 = tpu.matmul %10, %11, %cst_11 {dimension_numbers = #tpu.dot_dimension_numbers<[1], [0], [0], [1], [0, 0, 1, 1], [], []>} : vector<2x8xf32>, vector<8x64xf32>, vector<2x64xf32> -> vector<2x64xf32>
    %c0_12 = arith.constant 0 : index
    %c0_13 = arith.constant 0 : index
    %13 = vector.load %arg5[%c0_12, %c0_13] : memref<1x64xf32, #tpu.memory_space<vmem>>, vector<1x64xf32>
    %14 = vector.broadcast %13 : vector<1x64xf32> to vector<2x64xf32>
    %15 = arith.addf %12, %14 : vector<2x64xf32>
    %16 = arith.negf %15 : vector<2x64xf32>
    %17 = math.exp %16 : vector<2x64xf32>
    %cst_14 = arith.constant 1.000000e+00 : f32
    %18 = vector.broadcast %cst_14 : f32 to vector<2x64xf32>
    %19 = arith.addf %18, %17 : vector<2x64xf32>
    %20 = arith.divf %18, %19 : vector<2x64xf32>
    %21 = vector.shape_cast %20 : vector<2x64xf32> to vector<2x64x1xf32>
    %22 = vector.broadcast %21 : vector<2x64x1xf32> to vector<2x64x256xf32>
    %23 = arith.mulf %0, %22 : vector<2x64x256xf32>
    %c0_15 = arith.constant 0 : index
    %c0_16 = arith.constant 0 : index
    %c0_17 = arith.constant 0 : index
    %24 = vector.load %arg6[%c0_15, %c0_16, %c0_17] : memref<2x64x256xf32, #tpu.memory_space<vmem>>, vector<2x64x256xf32>
    tpu.vector_store %arg6[%c0_15, %c0_16, %c0_17], %23 {strides = array<i32>} : memref<2x64x256xf32, #tpu.memory_space<vmem>>, vector<2x64x256xf32>,
    return
  }
  func.func @transform_0(%arg0: i32) -> (i32, i32, i32) {
    %c0_i32 = arith.constant 0 : i32
    %c0_i32_0 = arith.constant 0 : i32
    %c0_i32_1 = arith.constant 0 : i32
    return %arg0, %c0_i32, %c0_i32_0 : i32, i32, i32
  }
  func.func @transform_1(%arg0: i32) -> (i32, i32) {
    %c0_i32 = arith.constant 0 : i32
    %c0_i32_0 = arith.constant 0 : i32
    %c0_i32_1 = arith.constant 0 : i32
    return %c0_i32, %c0_i32_0 : i32, i32
  }
  func.func @transform_2(%arg0: i32) -> (i32, i32) {
    %c0_i32 = arith.constant 0 : i32
    %c0_i32_0 = arith.constant 0 : i32
    %c0_i32_1 = arith.constant 0 : i32
    return %c0_i32, %c0_i32_0 : i32, i32
  }
  func.func @transform_3(%arg0: i32) -> (i32, i32) {
    %c0_i32 = arith.constant 0 : i32
    %c0_i32_0 = arith.constant 0 : i32
    %c0_i32_1 = arith.constant 0 : i32
    return %c0_i32, %c0_i32_0 : i32, i32
  }
  func.func @transform_4(%arg0: i32) -> (i32, i32) {
    %c0_i32 = arith.constant 0 : i32
    %c0_i32_0 = arith.constant 0 : i32
    %c0_i32_1 = arith.constant 0 : i32
    return %c0_i32, %c0_i32_0 : i32, i32
  }
  func.func @transform_5(%arg0: i32) -> (i32, i32, i32) {
    %c0_i32 = arith.constant 0 : i32
    %c0_i32_0 = arith.constant 0 : i32
    %c0_i32_1 = arith.constant 0 : i32
    return %arg0, %c0_i32, %c0_i32_0 : i32, i32, i32
  }
}

</mosaic_0001>

<bundles_post_ra>
// kernel: tpu_custom_call.1
= control target key start
LH: loop header
LB: loop body
LE: loop exit
PB: predicated region body
PF: predicated region fallthrough
CT: control target
= control target key end

     0   :  { %10 = vsyncpa [#allocation3], 0  ;;  %s898_s0 = inlined_call_operand.hbm [shape: f32[2,64,256], index: 0, kind: input, shape index: {}]   ;;  %s899_s1 = inlined_call_operand.vmem [shape: f32[64,8], index: 1, kind: input, shape index: {}]   ;;  %s900_s2 = inlined_call_operand.vmem [shape: f32[1,8], index: 2, kind: input, shape index: {}]   ;;  %s901_s3 = inlined_call_operand.vmem [shape: f32[8,64], index: 3, kind: input, shape index: {}]   ;;  %s902_s4 = inlined_call_operand.vmem [shape: f32[1,64], index: 4, kind: input, shape index: {}]   ;;  %s903_s5 = inlined_call_operand.hbm [shape: f32[2,64,256], index: 5, kind: output, shape index: {}]  }
   0x1   :  { %11 = vsyncpa [#allocation4], 0  ;;  %s665_s18 = smov [#allocation2]  }
   0x2   :  { %s17_s19 = sshll.u32 %s665_s18, 4  ;;  %s18_s19 = int_to_ptr.vmem [resolvable:$true] %s17_s19 }
   0x3   :  { %s629_s20 = scalar_lea.vmem %s18_s19, 4096  ;;  %p634_p1 = scmp.lt.s32.totalorder %s18_s19, %s18_s19 }
   0x4   :  { %p630_p0 = scmp.ne.s32.totalorder %s18_s19, %s629_s20  ;;  %p635_p2 = scmp.lt.s32.totalorder %s629_s20, %s629_s20 }
   0x6   :  { %p636_p3 = por %p635_p2, %p634_p1 }
   0x8   :  { %p637_p4 = pnand %p636_p3, %p630_p0 }
   0xa   :  { %640 = shalt.err (!%p637_p4)
}
   0xb   :  { %s666_s21 = smov 256   ;;  %s667_s22 = smov 16  }
   0xc   :  { %23 = dma.hbm_to_vmem [thread:$0]  %s898_s0, 4096, %s18_s19, [#allocation3], %s666_s21, %s666_s21, %s667_s22  }
   0xd   :  { %661 = dma.done.wait [#allocation3], 4096  }
   0xe   :  { %662 = vsyncadd [#allocation3], 4294963200  ;;  %v707_v0 = vld [vmem:[#allocation2 + $0x80] sm:$0xff]  ;;  %v709_v1 = vld [vmem:[#allocation2 + $0x88] sm:$0xff]  ;;  %v668_v48 = vmov 0.0   ;;  %vm669_vm0 = vmmov 0   ;;  %v162_v61 = vlaneseq }
   0xf   :  { %v711_v2 = vld [vmem:[#allocation2] sm:$0xff]  ;;  %v91_v3 = vadd.f32 %v709_v1, %v707_v0  ;;  %v715_v4 = vld [vmem:[#allocation2 + $0x8] sm:$0xff]  ;;  %v717_v5 = vld [vmem:[#allocation2 + $0x90] sm:$0xff]  ;;  %587 = vmatprep.subr.mxu0 %v668_v48  ;;  %606 = vmatprep.subr.mxu1 %v668_v48  ;;  %vm173_vm1 = vcmask 130112   ;;  %vm180_vm2 = vcmask 195712   ;;  %vm187_vm3 = vcmask 261312  }
  0x10   :  { %v719_v6 = vld [vmem:[#allocation2 + $0x98] sm:$0xff]  ;;  %v67_v7 = vadd.f32 %v715_v4, %v711_v2  ;;  %v723_v8 = vld [vmem:[#allocation2 + $0x10] sm:$0xff]  ;;  %v731_v12 = vld [vmem:[#allocation2 + $0xa0] sm:$0xff]  ;;  %603 = vmatprep.mubr.msk.f32.mxu0 %vm669_vm0, %v668_v48  ;;  %608 = vmatprep.mubr.msk.f32.mxu1 %vm669_vm0, %v668_v48  ;;  %vm194_vm4 = vcmask 326912   ;;  %vm201_vm5 = vcmask 392512   ;;  %vm208_vm6 = vcmask 458112  }
  0x11   :  { %v725_v9 = vld [vmem:[#allocation2 + $0x18] sm:$0xff]  ;;  %92 = vadd.xlane.f32.xlu1 %v91_v3  ;;  %v94_v10 = vadd.f32 %v719_v6, %v717_v5  ;;  %v733_v13 = vld [vmem:[#allocation2 + $0xa8] sm:$0xff]  ;;  %v735_v14 = vld [vmem:[#allocation2 + $0x20] sm:$0xff]  ;;  %v163_v3 = vand.u32 127, %v162_v61  ;;  %vm215_vm7 = vcmask 523712   ;;  %vm256_vm8 = vcmask 1041409  }
  0x12   :  { %68 = vadd.xlane.f32.xlu0 %v67_v7  ;;  %v70_v11 = vadd.f32 %v725_v9, %v723_v8  ;;  %v737_v15 = vld [vmem:[#allocation2 + $0x28] sm:$0xff]  ;;  %v97_v16 = vadd.f32 %v733_v13, %v731_v12  ;;  %v743_v18 = vld [vmem:[#allocation2 + $0xb0] sm:$0xff]  ;;  %v745_v19 = vld [vmem:[#allocation2 + $0xb8] sm:$0xff]  ;;  %vm258_vm9 = vcmask 523264   ;;  %vm340_vm10 = vcmask 64512  }
  0x13   :  { %v73_v17 = vadd.f32 %v737_v15, %v735_v14  ;;  %911 = vst [vmem:[#allocation8_spill] sm:$0xff] %v745_v19  ;;  %v747_v20 = vld [vmem:[#allocation2 + $0x30] sm:$0xff]  ;;  %v749_v21 = vld [vmem:[#allocation2 + $0x38] sm:$0xff]  ;;  %v100_v22 = vadd.f32 %v745_v19, %v743_v18  ;;  %v755_v24 = vld [vmem:[#allocation2 + $0xc0] sm:$0xff] }
  0x14   :  { %v76_v23 = vadd.f32 %v749_v21, %v747_v20  ;;  %v757_v25 = vld [vmem:[#allocation2 + $0xc8] sm:$0xff]  ;;  %v759_v26 = vld [vmem:[#allocation2 + $0x40] sm:$0xff]  ;;  %v767_v30 = vld [vmem:[#allocation2 + $0xd0] sm:$0xff] }
  0x15   :  { %95 = vadd.xlane.f32.xlu1 %v94_v10  ;;  %v761_v27 = vld [vmem:[#allocation2 + $0x48] sm:$0xff]  ;;  %v103_v28 = vadd.f32 %v757_v25, %v755_v24  ;;  %912 = vst [vmem:[#allocation9_spill] sm:$0xff] %v767_v30  ;;  %v769_v31 = vld [vmem:[#allocation2 + $0xd8] sm:$0xff]  ;;  %v771_v32 = vld [vmem:[#allocation2 + $0x50] sm:$0xff]  ;;  %v827_v10 = vshrl.u32 %v162_v61, 7 }
  0x16   :  { %71 = vadd.xlane.f32.xlu0 %v70_v11  ;;  %v79_v29 = vadd.f32 %v761_v27, %v759_v26  ;;  %913 = vst [vmem:[#allocation10_spill] sm:$0xff] %v769_v31  ;;  %v773_v33 = vld [vmem:[#allocation2 + $0x58] sm:$0xff]  ;;  %v106_v34 = vadd.f32 %v769_v31, %v767_v30  ;;  %v779_v36 = vld [vmem:[#allocation2 + $0xe0] sm:$0xff]  ;;  %v781_v37 = vld [vmem:[#allocation2 + $0xe8] sm:$0xff] }
  0x17   :  { %v82_v35 = vadd.f32 %v773_v33, %v771_v32  ;;  %914 = vst [vmem:[#allocation11_spill] sm:$0xff] %v779_v36  ;;  %915 = vst [vmem:[#allocation12_spill] sm:$0xff] %v781_v37  ;;  %v783_v38 = vld [vmem:[#allocation2 + $0x60] sm:$0xff]  ;;  %v785_v39 = vld [vmem:[#allocation2 + $0x68] sm:$0xff]  ;;  %v109_v40 = vadd.f32 %v781_v37, %v779_v36 }
  0x18   :  { %v85_v41 = vadd.f32 %v785_v39, %v783_v38  ;;  %v791_v42 = vld [vmem:[#allocation2 + $0xf0] sm:$0xff]  ;;  %v793_v43 = vld [vmem:[#allocation2 + $0xf8] sm:$0xff]  ;;  %v136_v51 = vld [vmem:[%s899_s1 + $0x28] sm:$0xff] }
  0x19   :  { %98 = vadd.xlane.f32.xlu1 %v97_v16  ;;  %916 = vst [vmem:[#allocation13_spill] sm:$0xff] %v791_v42  ;;  %917 = vst [vmem:[#allocation14_spill] sm:$0xff] %v793_v43  ;;  %v795_v44 = vld [vmem:[#allocation2 + $0x70] sm:$0xff]  ;;  %v797_v45 = vld [vmem:[#allocation2 + $0x78] sm:$0xff]  ;;  %v112_v46 = vadd.f32 %v793_v43, %v791_v42  ;;  %v168_v16 = vadd.s32 4294967288, %v163_v3 }
  0x1a   :  { %74 = vadd.xlane.f32.xlu0 %v73_v17  ;;  %v88_v47 = vadd.f32 %v797_v45, %v795_v44  ;;  %v138_v49 = vld [vmem:[%s899_s1 + $0x38] sm:$0xff]  ;;  %v137_v50 = vld [vmem:[%s899_s1 + $0x30] sm:$0xff]  ;;  %v135_v52 = vld [vmem:[%s899_s1 + $0x20] sm:$0xff]  ;;  %v175_v17 = vadd.s32 4294967280, %v163_v3 }
  0x1b   :  { %588 = vmatpush3.msra.mxu0 %v138_v49  ;;  %v134_v53 = vld [vmem:[%s899_s1 + $0x18] sm:$0xff]  ;;  %v133_v54 = vld [vmem:[%s899_s1 + $0x10] sm:$0xff]  ;;  %v132_v55 = vld [vmem:[%s899_s1 + $0x8] sm:$0xff] }
  0x1c   :  { %589 = vmatprep.subr.mxu0 %v668_v48  ;;  %v131_v56 = vld [vmem:[%s899_s1] sm:$0xff] }
  0x1d   :  { %101 = vadd.xlane.f32.xlu1 %v100_v22  ;;  %590 = vmatpush3.msra.mxu0 %v137_v50  ;;  %v182_v22 = vadd.s32 4294967272, %v163_v3 }
  0x1e   :  { %77 = vadd.xlane.f32.xlu0 %v76_v23  ;;  %591 = vmatprep.subr.mxu0 %v668_v48  ;;  %v189_v23 = vadd.s32 4294967264, %v163_v3 }
  0x1f   :  { %592 = vmatpush3.msra.mxu0 %v136_v51 }
  0x20   :  { %593 = vmatprep.subr.mxu0 %v668_v48  ;;  %v192_v49 = vsub.s32 %v189_v23, %v827_v10  ;;  %v210_v23 = vadd.s32 4294967240, %v163_v3 }
  0x21   :  { %104 = vadd.xlane.f32.xlu1 %v103_v28  ;;  %594 = vmatpush3.msra.mxu0 %v135_v52 }
  0x22   :  { %80 = vadd.xlane.f32.xlu0 %v79_v29  ;;  %595 = vmatprep.subr.mxu0 %v668_v48  ;;  %v196_v29 = vadd.s32 4294967256, %v163_v3 }
  0x23   :  { %596 = vmatpush3.msra.mxu0 %v134_v53 }
  0x24   :  { %597 = vmatprep.subr.mxu0 %v668_v48  ;;  %v199_v52 = vsub.s32 %v196_v29, %v827_v10 }
  0x25   :  { %107 = vadd.xlane.f32.xlu1 %v106_v34  ;;  %598 = vmatpush3.msra.mxu0 %v133_v54  ;;  %v166_v34 = vsub.s32 %v163_v3, %v827_v10 }
  0x26   :  { %83 = vadd.xlane.f32.xlu0 %v82_v35  ;;  %599 = vmatprep.subr.mxu0 %v668_v48 }
  0x27   :  { %600 = vmatpush3.msra.mxu0 %v132_v55 }
  0x28   :  { %601 = vmatprep.subr.mxu0 %v668_v48  ;;  %v185_v48 = vsub.s32 %v182_v22, %v827_v10 }
  0x29   :  { %110 = vadd.xlane.f32.xlu1 %v109_v40  ;;  %602 = vmatpush3.msra.mxu0 %v131_v56  ;;  %v171_v40 = vsub.s32 %v168_v16, %v827_v10 }
  0x2a   :  { %86 = vadd.xlane.f32.xlu0 %v85_v41  ;;  %v178_v41 = vsub.s32 %v175_v17, %v827_v10 }
  0x2d   :  { %113 = vadd.xlane.f32.xlu1 %v112_v46  ;;  %v203_v46 = vadd.s32 4294967248, %v163_v3  ;;  %v213_v3 = vsub.s32 %v210_v23, %v827_v10  ;;  %v571_v23 = vld [vmem:[%s900_s2] ss:$0 sm:$0xff]  ;;  %s670_s2 = smov [#allocation5]  }
  0x2e   :  { %89 = vadd.xlane.f32.xlu0 %v88_v47 }
  0x9a   :  { %v93_v57 = vpop.xlane.xlu1 %92 }
  0x9b   :  { %v69_v58 = vpop.xlane.xlu0 %68  ;;  %v123_v54 = vmul.f32 0.00390625, %v93_v57 }
  0x9c   :  { %v115_v16 = vmul.f32 0.00390625, %v69_v58 }
  0x9d   :  { %v220_v37 = vrot.slane %v123_v54, %v166_v34 }
  0x9e   :  { %v96_v59 = vpop.xlane.xlu1 %95  ;;  %v167_v19 = vrot.slane %v115_v16, %v166_v34 }
  0x9f   :  { %v72_v60 = vpop.xlane.xlu0 %71  ;;  %v124_v47 = vmul.f32 0.00390625, %v96_v59  ;;  %v206_v59 = vsub.s32 %v203_v46, %v827_v10 }
  0xa0   :  { %v116_v50 = vmul.f32 0.00390625, %v72_v60 }
  0xa1   :  { %v224_v22 = vrot.slane %v124_v47, %v171_v40 }
  0xa2   :  { %v99_v62 = vpop.xlane.xlu1 %98  ;;  %v172_v60 = vrot.slane %v116_v50, %v171_v40 }
  0xa3   :  { %v75_v63 = vpop.xlane.xlu0 %74  ;;  %v125_v51 = vmul.f32 0.00390625, %v99_v62  ;;  %v225_v46 = vsel %vm173_vm1, %v224_v22, %v220_v37  ;;  %v332_v22 = vld [vmem:[%s901_s3] sm:$0xff]  ;;  %s559_s3 = sshll.u32 %s670_s2, 4  ;;  %s560_s3 = int_to_ptr.vmem [resolvable:$true] %s559_s3 }
  0xa4   :  { %v117_v55 = vmul.f32 0.00390625, %v75_v63  ;;  %v174_v40 = vsel %vm173_vm1, %v172_v60, %v167_v19  ;;  %607 = vmatpush3.msra.mxu1 %v332_v22  ;;  %v919_v22 = vld [vmem:[#allocation11_spill] sm:$0xff]  ;;  %p646_p6 = scmp.lt.s32.totalorder %s560_s3, %s560_s3 }
  0xa5   :  { %v229_v62 = vrot.slane %v125_v51, %v178_v41 }
  0xa6   :  { %v102_v7 = vpop.xlane.xlu1 %101  ;;  %v179_v57 = vrot.slane %v117_v55, %v178_v41 }
  0xa7   :  { %v78_v11 = vpop.xlane.xlu0 %77  ;;  %v126_v56 = vmul.f32 0.00390625, %v102_v7  ;;  %v230_v50 = vsel %vm180_vm2, %v229_v62, %v225_v46 }
  0xa8   :  { %v118_v17 = vmul.f32 0.00390625, %v78_v11  ;;  %v181_v54 = vsel %vm180_vm2, %v179_v57, %v174_v40 }
  0xa9   :  { %v234_v63 = vrot.slane %v126_v56, %v185_v48 }
  0xaa   :  { %v105_v28 = vpop.xlane.xlu1 %104  ;;  %v186_v58 = vrot.slane %v118_v17, %v185_v48 }
  0xab   :  { %v81_v35 = vpop.xlane.xlu0 %80  ;;  %v127_v43 = vmul.f32 0.00390625, %v105_v28  ;;  %v235_v34 = vsel %vm187_vm3, %v234_v63, %v230_v50  ;;  %v573_v63 = vld [vmem:[%s902_s4] ss:$0 sm:$0xff]  ;;  %v457_v50 = vsub.s32 1, %v827_v10  ;;  %s641_s4 = scalar_lea.vmem %s560_s3, 4096 }
  0xac   :  { %v119_v42 = vmul.f32 0.00390625, %v81_v35  ;;  %v188_v37 = vsel %vm187_vm3, %v186_v58, %v181_v54  ;;  %p642_p5 = scmp.ne.s32.totalorder %s560_s3, %s641_s4  ;;  %p647_p7 = scmp.lt.s32.totalorder %s641_s4, %s641_s4 }
  0xad   :  { %v239_v11 = vrot.slane %v127_v43, %v192_v49 }
  0xae   :  { %v108_v53 = vpop.xlane.xlu1 %107  ;;  %v193_v47 = vrot.slane %v119_v42, %v192_v49  ;;  %p648_p8 = por %p647_p7, %p646_p6 }
  0xaf   :  { %v84_v61 = vpop.xlane.xlu0 %83  ;;  %v128_v31 = vmul.f32 0.00390625, %v108_v53 }
  0xb0   :  { %v120_v30 = vmul.f32 0.00390625, %v84_v61  ;;  %v195_v19 = vsel %vm194_vm4, %v193_v47, %v188_v37  ;;  %p649_p9 = pnand %p648_p8, %p642_p5 }
  0xb1   :  { %v244_v35 = vrot.slane %v128_v31, %v199_v52  ;;  %v240_v31 = vsel %vm194_vm4, %v239_v11, %v235_v34 }
  0xb2   :  { %v111_v29 = vpop.xlane.xlu1 %110  ;;  %v200_v51 = vrot.slane %v120_v30, %v199_v52 }
  0xb3   :  { %v129_v7 = vmul.f32 0.00390625, %v111_v29  ;;  %v87_v36 = vpop.xlane.xlu0 %86  ;;  %v245_v49 = vsel %vm201_vm5, %v244_v35, %v240_v31  ;;  %v422_v35 = vsub.s32 0, %v827_v10 }
  0xb4   :  { %v121_v28 = vmul.f32 0.00390625, %v87_v36  ;;  %v202_v52 = vsel %vm201_vm5, %v200_v51, %v195_v19 }
  0xb5   :  { %v249_v53 = vrot.slane %v129_v7, %v206_v59 }
  0xb6   :  { %v114_v41 = vpop.xlane.xlu1 %113  ;;  %v207_v48 = vrot.slane %v121_v28, %v206_v59 }
  0xb7   :  { %v130_v43 = vmul.f32 0.00390625, %v114_v41  ;;  %v90_v36 = vpop.xlane.xlu0 %89  ;;  %v250_v55 = vsel %vm208_vm6, %v249_v53, %v245_v49 }
  0xb8   :  { %v122_v42 = vmul.f32 0.00390625, %v90_v36  ;;  %v209_v61 = vsel %vm208_vm6, %v207_v48, %v202_v52 }
  0xb9   :  { %v254_v30 = vrot.slane %v130_v43, %v213_v3 }
  0xba   :  { %v214_v56 = vrot.slane %v122_v42, %v213_v3 }
  0xbb   :  { %v255_v16 = vsel %vm215_vm7, %v254_v30, %v250_v55 }
  0xbc   :  { %v216_v17 = vsel %vm215_vm7, %v214_v56, %v209_v61 }
  0xbd   :  { %v257_v59 = vsel %vm256_vm8, %v255_v16, %v216_v17  ;;  %v918_v17 = vld [vmem:[#allocation8_spill] sm:$0xff] }
  0xbe   :  { %604 = vmatmul.mubr.msk.f32.vlgmr.msra.gmra.mxu0 %vm258_vm9, %v257_v59 }
 0x17e   :  { %v327_v60 = vpop.f32.mrf.mxu0 }
 0x17f   :  { %v328_v62 = vadd.f32 %v571_v23, %v327_v60  ;;  %v920_v60 = vld [vmem:[#allocation12_spill] sm:$0xff] }
 0x180   :  { %v605_v29 = vpop.f32.mrf.mxu0 }
 0x181   :  { %v331_v57 = vmax.f32 %v328_v62, 0.0  ;;  %v922_v62 = vld [vmem:[#allocation10_spill] sm:$0xff] }
 0x183   :  { %609 = vmatmul.mubr.msk.f32.vlgmr.msra.gmra.mxu1 %vm340_vm10, %v331_v57  ;;  %v923_v57 = vld [vmem:[#allocation13_spill] sm:$0xff] }
 0x243   :  { %v410_v7 = vpop.f32.mrf.mxu1 }
 0x244   :  { %v411_v58 = vadd.f32 %v573_v63, %v410_v7  ;;  %v924_v7 = vld [vmem:[#allocation14_spill] sm:$0xff] }
 0x245   :  { %v610_v11 = vpop.f32.mrf.mxu1 }
 0x246   :  { %v575_v28 = vmul.f32 -1.442695, %v411_v58 }
 0x248   :  { %617 = vpow2.f32 %v575_v28 }
 0x255   :  { %v618_v46 = vpop.eup %617 }
 0x256   :  { %v417_v47 = vadd.f32 1.0, %v618_v46 }
 0x258   :  { %619 = vrcp.f32 %v417_v47 }
 0x265   :  { %v620_v3 = vpop.eup %619 }
 0x266   :  { %v423_v40 = vrot.slane %v620_v3, %v422_v35  ;;  %v458_v51 = vrot.slane %v620_v3, %v457_v50 }
 0x268   :  { %429 = vbcast.lane.b32.xlu1 %v423_v40, 264  ;;  %425 = vbcast.lane.b32.xlu0 %v423_v40, 256 }
 0x26c   :  { %433 = vbcast.lane.b32.xlu1 %v423_v40, 272  ;;  %441 = vbcast.lane.b32.xlu0 %v423_v40, 288 }
 0x270   :  { %437 = vbcast.lane.b32.xlu1 %v423_v40, 280  ;;  %449 = vbcast.lane.b32.xlu0 %v423_v40, 304 }
 0x274   :  { %445 = vbcast.lane.b32.xlu1 %v423_v40, 296  ;;  %460 = vbcast.lane.b32.xlu0 %v458_v51, 256 }
 0x278   :  { %453 = vbcast.lane.b32.xlu1 %v423_v40, 312  ;;  %468 = vbcast.lane.b32.xlu0 %v458_v51, 272 }
 0x27c   :  { %464 = vbcast.lane.b32.xlu1 %v458_v51, 264  ;;  %476 = vbcast.lane.b32.xlu0 %v458_v51, 288 }
 0x280   :  { %472 = vbcast.lane.b32.xlu1 %v458_v51, 280  ;;  %484 = vbcast.lane.b32.xlu0 %v458_v51, 304 }
 0x284   :  { %480 = vbcast.lane.b32.xlu1 %v458_v51, 296 }
 0x288   :  { %488 = vbcast.lane.b32.xlu1 %v458_v51, 312 }
 0x2da   :  { %v430_v53 = vpop.permute.xlu1 %429  ;;  %v426_v41 = vpop.permute.xlu0 %425 }
 0x2db   :  { %v492_v54 = vmul.f32 %v430_v53, %v723_v8  ;;  %v493_v34 = vmul.f32 %v430_v53, %v725_v9  ;;  %v490_v10 = vmul.f32 %v426_v41, %v711_v2  ;;  %v491_v48 = vmul.f32 %v426_v41, %v715_v4 }
 0x2dd   :  { %524 = vst [vmem:[#allocation5 + $0x10] sm:$0xff] %v492_v54  ;;  %525 = vst [vmem:[#allocation5 + $0x18] sm:$0xff] %v493_v34 }
 0x2de   :  { %522 = vst [vmem:[#allocation5] sm:$0xff] %v490_v10  ;;  %523 = vst [vmem:[#allocation5 + $0x8] sm:$0xff] %v491_v48  ;;  %v434_v43 = vpop.permute.xlu1 %433  ;;  %v442_v36 = vpop.permute.xlu0 %441 }
 0x2df   :  { %v494_v37 = vmul.f32 %v434_v43, %v735_v14  ;;  %v495_v31 = vmul.f32 %v434_v43, %v737_v15  ;;  %v498_v42 = vmul.f32 %v442_v36, %v759_v26  ;;  %v499_v8 = vmul.f32 %v442_v36, %v761_v27 }
 0x2e1   :  { %526 = vst [vmem:[#allocation5 + $0x20] sm:$0xff] %v494_v37  ;;  %527 = vst [vmem:[#allocation5 + $0x28] sm:$0xff] %v495_v31 }
 0x2e2   :  { %530 = vst [vmem:[#allocation5 + $0x40] sm:$0xff] %v498_v42  ;;  %531 = vst [vmem:[#allocation5 + $0x48] sm:$0xff] %v499_v8  ;;  %v438_v2 = vpop.permute.xlu1 %437  ;;  %v450_v4 = vpop.permute.xlu0 %449 }
 0x2e3   :  { %v496_v9 = vmul.f32 %v438_v2, %v747_v20  ;;  %v497_v19 = vmul.f32 %v438_v2, %v749_v21  ;;  %v502_v49 = vmul.f32 %v450_v4, %v783_v38  ;;  %v503_v14 = vmul.f32 %v450_v4, %v785_v39 }
 0x2e5   :  { %528 = vst [vmem:[#allocation5 + $0x30] sm:$0xff] %v496_v9  ;;  %529 = vst [vmem:[#allocation5 + $0x38] sm:$0xff] %v497_v19 }
 0x2e6   :  { %534 = vst [vmem:[#allocation5 + $0x60] sm:$0xff] %v502_v49  ;;  %535 = vst [vmem:[#allocation5 + $0x68] sm:$0xff] %v503_v14  ;;  %v446_v15 = vpop.permute.xlu1 %445  ;;  %v461_v26 = vpop.permute.xlu0 %460 }
 0x2e7   :  { %v500_v27 = vmul.f32 %v446_v15, %v771_v32  ;;  %v501_v30 = vmul.f32 %v446_v15, %v773_v33  ;;  %v506_v52 = vmul.f32 %v461_v26, %v707_v0  ;;  %v507_v20 = vmul.f32 %v461_v26, %v709_v1 }
 0x2e9   :  { %532 = vst [vmem:[#allocation5 + $0x50] sm:$0xff] %v500_v27  ;;  %533 = vst [vmem:[#allocation5 + $0x58] sm:$0xff] %v501_v30 }
 0x2ea   :  { %538 = vst [vmem:[#allocation5 + $0x80] sm:$0xff] %v506_v52  ;;  %539 = vst [vmem:[#allocation5 + $0x88] sm:$0xff] %v507_v20  ;;  %v454_v21 = vpop.permute.xlu1 %453  ;;  %v469_v38 = vpop.permute.xlu0 %468 }
 0x2eb   :  { %v504_v39 = vmul.f32 %v454_v21, %v795_v44  ;;  %v505_v55 = vmul.f32 %v454_v21, %v797_v45  ;;  %v510_v56 = vmul.f32 %v469_v38, %v731_v12  ;;  %v511_v32 = vmul.f32 %v469_v38, %v733_v13 }
 0x2ed   :  { %536 = vst [vmem:[#allocation5 + $0x70] sm:$0xff] %v504_v39  ;;  %537 = vst [vmem:[#allocation5 + $0x78] sm:$0xff] %v505_v55 }
 0x2ee   :  { %542 = vst [vmem:[#allocation5 + $0xa0] sm:$0xff] %v510_v56  ;;  %543 = vst [vmem:[#allocation5 + $0xa8] sm:$0xff] %v511_v32  ;;  %v465_v0 = vpop.permute.xlu1 %464  ;;  %v477_v1 = vpop.permute.xlu0 %476 }
 0x2ef   :  { %v508_v33 = vmul.f32 %v465_v0, %v717_v5  ;;  %v509_v61 = vmul.f32 %v465_v0, %v719_v6  ;;  %v514_v16 = vmul.f32 %v477_v1, %v755_v24  ;;  %v515_v44 = vmul.f32 %v477_v1, %v757_v25  ;;  %v921_v24 = vld [vmem:[#allocation9_spill] sm:$0xff] }
 0x2f1   :  { %540 = vst [vmem:[#allocation5 + $0x90] sm:$0xff] %v508_v33  ;;  %541 = vst [vmem:[#allocation5 + $0x98] sm:$0xff] %v509_v61 }
 0x2f2   :  { %546 = vst [vmem:[#allocation5 + $0xc0] sm:$0xff] %v514_v16  ;;  %547 = vst [vmem:[#allocation5 + $0xc8] sm:$0xff] %v515_v44  ;;  %v473_v12 = vpop.permute.xlu1 %472  ;;  %v485_v13 = vpop.permute.xlu0 %484 }
 0x2f3   :  { %v512_v45 = vmul.f32 %v473_v12, %v743_v18  ;;  %v513_v59 = vmul.f32 %v473_v12, %v918_v17  ;;  %v518_v23 = vmul.f32 %v485_v13, %v919_v22  ;;  %v519_v5 = vmul.f32 %v485_v13, %v920_v60 }
 0x2f5   :  { %544 = vst [vmem:[#allocation5 + $0xb0] sm:$0xff] %v512_v45  ;;  %545 = vst [vmem:[#allocation5 + $0xb8] sm:$0xff] %v513_v59 }
 0x2f6   :  { %550 = vst [vmem:[#allocation5 + $0xe0] sm:$0xff] %v518_v23  ;;  %551 = vst [vmem:[#allocation5 + $0xe8] sm:$0xff] %v519_v5  ;;  %v481_v6 = vpop.permute.xlu1 %480 }
 0x2f7   :  { %v516_v25 = vmul.f32 %v481_v6, %v921_v24  ;;  %v517_v29 = vmul.f32 %v481_v6, %v922_v62 }
 0x2f9   :  { %548 = vst [vmem:[#allocation5 + $0xd0] sm:$0xff] %v516_v25  ;;  %549 = vst [vmem:[#allocation5 + $0xd8] sm:$0xff] %v517_v29 }
 0x2fa   :  { %v489_v18 = vpop.permute.xlu1 %488 }
 0x2fb   :  { %v520_v63 = vmul.f32 %v489_v18, %v923_v57  ;;  %v521_v58 = vmul.f32 %v489_v18, %v924_v7 }
 0x2fd   :  { %552 = vst [vmem:[#allocation5 + $0xf0] sm:$0xff] %v520_v63  ;;  %553 = vst [vmem:[#allocation5 + $0xf8] sm:$0xff] %v521_v58 }
 0x2fe   :  { %652 = shalt.err (!%p649_p9)
}
 0x2ff   :  { %565 = dma.vmem_to_hbm [thread:$0]  %s560_s3, 4096, %s903_s5, [#allocation4], %s666_s21, %s666_s21, %s667_s22  }
 0x300   :  { %663 = dma.done.wait [#allocation4], 4096  }
 0x301   :  { %664 = vsyncadd [#allocation4], 4294963200 }
 0x302   :  { %569 = vsyncpa [#allocation3], 1 }
 0x303   :  { %570 = vsyncpa [#allocation4], 1 }

</bundles_post_ra>
